<compile_context>
chip_gen: v7x
topology: tpu7x:2x2x1
jax: 0.10.0
libtpu: 0.0.40
codegen_flags: <defaults>
</compile_context>

<pallas_src>
import jax
import jax.numpy as jnp
from jax import lax
from jax.experimental import pallas as pl
from jax.experimental.pallas import tpu as pltpu


# ----------------------------------------------------------------------------
# Helpers: complex <-> real-isomorphic ("blockified") representation
# ----------------------------------------------------------------------------
def _blockify(m_re: jnp.ndarray, m_im: jnp.ndarray) -> jnp.ndarray:
    """R(M) = [[Re, Im], [-Im, Re]]  so that  [xr|xi] @ R(M) == [Re(xM)|Im(xM)]."""
    top = jnp.concatenate([m_re, m_im], axis=1)
    bot = jnp.concatenate([-m_im, m_re], axis=1)
    return jnp.concatenate([top, bot], axis=0)


# ----------------------------------------------------------------------------
# Pallas kernel: tiled f32 matmul with VMEM accumulator
# ----------------------------------------------------------------------------
def _matmul_kernel(x_ref, b_ref, o_ref, acc_ref):
    @pl.when(pl.program_id(2) == 0)
    def _init():
        acc_ref[...] = jnp.zeros_like(acc_ref)

    acc_ref[...] += jnp.dot(
        x_ref[...], b_ref[...], preferred_element_type=jnp.float32
    )

    @pl.when(pl.program_id(2) == pl.num_programs(2) - 1)
    def _finalize():
        o_ref[...] = acc_ref[...].astype(o_ref.dtype)


def _tiled_matmul(x: jnp.ndarray, b: jnp.ndarray) -> jnp.ndarray:
    """(m, k) f32 @ (k, n) f32 -> (m, n) f32 on the MXU via Pallas."""
    m, k = x.shape
    k2, n = b.shape
    assert k == k2

    # Tile sizes: full extent for small dims; lane-aligned tiles otherwise.
    tm = m if m <= 128 else 128          # caller pads m accordingly
    tn = n if n < 256 else 256           # n is a power of two (2 * 2**num_qubits)
    tk = k if k < 512 else 512
    grid = (m // tm, n // tn, k // tk)

    cost = pl.CostEstimate(
        flops=2 * m * n * k,
        transcendentals=0,
        bytes_accessed=4 * (m * k + k * n + m * n),
    )

    return pl.pallas_call(
        _matmul_kernel,
        out_shape=jax.ShapeDtypeStruct((m, n), jnp.float32),
        grid_spec=pltpu.PrefetchScalarGridSpec(
            num_scalar_prefetch=0,
            grid=grid,
            in_specs=[
                pl.BlockSpec((tm, tk), lambda i, j, kk: (i, kk)),
                pl.BlockSpec((tk, tn), lambda i, j, kk: (kk, j)),
            ],
            out_specs=pl.BlockSpec((tm, tn), lambda i, j, kk: (i, j)),
            scratch_shapes=[pltpu.VMEM((tm, tn), jnp.float32)],
        ),
        compiler_params=pltpu.CompilerParams(
            dimension_semantics=("parallel", "parallel", "arbitrary"),
            vmem_limit_bytes=32 * 1024 * 1024,  # safe on v5e/v6e/v7x
        ),
        cost_estimate=cost,
    )(x, b)


# ----------------------------------------------------------------------------
# BuiltInvert.forward
# ----------------------------------------------------------------------------
def built_invert_forward(state: jnp.ndarray, target_matrix: jnp.ndarray) -> jnp.ndarray:
    """state: (batch, 2**n) complex64; target_matrix: (2**n, 2**n) complex64.

    Returns state @ inv(target_matrix) as complex64, matching BuiltInvert.forward.
    """
    batch, dim = state.shape
    d2 = 2 * dim

    # Inverse of the target gate in the real-isomorphic representation.
    # inv(R(M)) == R(inv(M)), so this is exactly the blockified complex inverse.
    b_fwd = _blockify(
        jnp.real(target_matrix).astype(jnp.float32),
        jnp.imag(target_matrix).astype(jnp.float32),
    )
    b_inv = jnp.linalg.inv(b_fwd)  # (2D, 2D) float32

    # State -> real row-block [Re | Im], a single lane-dense (batch, 2D) slab.
    x = jnp.concatenate(
        [jnp.real(state).astype(jnp.float32), jnp.imag(state).astype(jnp.float32)],
        axis=1,
    )

    # Pad batch so the sublane (second-to-last) tile dim is legal.
    if batch <= 128:
        batch_p = ((batch + 7) // 8) * 8
    else:
        batch_p = ((batch + 127) // 128) * 128
    if batch_p != batch:
        x = jnp.pad(x, ((0, batch_p - batch), (0, 0)))

    y = _tiled_matmul(x, b_inv)          # (batch_p, 2D) = [out_re | out_im]
    y = y[:batch]

    out = y[:, :dim] + 1j * y[:, dim:]
    return out.astype(jnp.complex64)


# ----------------------------------------------------------------------------
# Demo / self-test
# ----------------------------------------------------------------------------
def _rx(theta):
    c = jnp.cos(theta / 2)
    s = jnp.sin(theta / 2)
    return jnp.array([[c, -1j * s], [-1j * s, c]], dtype=jnp.complex64)


def _rz(theta):
    return jnp.array(
        [[jnp.exp(-1j * theta / 2), 0.0], [0.0, jnp.exp(1j * theta / 2)]],
        dtype=jnp.complex64,
    )


if __name__ == "__main__":
    num_qubits = 5            # Hilbert dim = 32
    dim = 2 ** num_qubits
    batch = 8

    key = jax.random.PRNGKey(0)
    k_th, k_re, k_im = jax.random.split(key, 3)

    # Deterministic unitary target gate matrix (what target.to_matrix() returns):
    # a layer of single-qubit rotations, RX / RZ alternating.
    thetas = jax.random.uniform(k_th, (num_qubits,), minval=0.1, maxval=2.0)
    target_matrix = jnp.array([[1.0 + 0.0j]], dtype=jnp.complex64)
    for q in range(num_qubits):
        gate = _rx(thetas[q]) if q % 2 == 0 else _rz(thetas[q])
        target_matrix = jnp.kron(target_matrix, gate)
    target_matrix = target_matrix.astype(jnp.complex64)

    # Deterministic input state batch.
    state = (
        jax.random.normal(k_re, (batch, dim), dtype=jnp.float32)
        + 1j * jax.random.normal(k_im, (batch, dim), dtype=jnp.float32)
    ).astype(jnp.complex64)

    out = jax.block_until_ready(built_invert_forward(state, target_matrix))

    # Reference: state @ inv(target_matrix).  The target is unitary, so its
    # inverse is exactly its conjugate transpose (independent of our LU path).
    ref = state @ jnp.conj(target_matrix).T

    assert out.shape == ref.shape and out.dtype == jnp.complex64
    assert jnp.allclose(out, ref, atol=1e-4, rtol=1e-4)

    print("KERNEL_OK")
</pallas_src>

<mosaic_0001>
module attributes {stable_mosaic.version = 11 : i64} {
  func.func @_matmul_kernel(%arg0: i32, %arg1: i32, %arg2: i32, %arg3: memref<8x64xf32, #tpu.memory_space<vmem>>, %arg4: memref<64x64xf32, #tpu.memory_space<vmem>>, %arg5: memref<8x64xf32, #tpu.memory_space<vmem>>, %arg6: memref<8x64xf32, #tpu.memory_space<vmem>>) attributes {dimension_semantics = [#tpu.dimension_semantics<parallel>, #tpu.dimension_semantics<parallel>, #tpu.dimension_semantics<arbitrary>], iteration_bounds = array<i64: 1, 1, 1>, scalar_prefetch = 0 : i64, scratch_operands = 1 : i64, tpu.core_type = #tpu.core_type<tc>, window_params = [{transform_indices = @transform_0, window_bounds = array<i64: 8, 64>}, {transform_indices = @transform_1, window_bounds = array<i64: 64, 64>}, {transform_indices = @transform_2, window_bounds = array<i64: 8, 64>}]} {
    %c0_i32 = arith.constant 0 : i32
    %0 = arith.cmpi eq, %arg2, %c0_i32 : i32
    %1 = arith.extui %0 : i1 to i32
    %c0_i32_0 = arith.constant 0 : i32
    %2 = arith.cmpi ne, %1, %c0_i32_0 : i32
    scf.if %2 {
      %cst_10 = arith.constant 0.000000e+00 : f32
      %12 = vector.broadcast %cst_10 : f32 to vector<8x64xf32>
      %c0_11 = arith.constant 0 : index
      %c0_12 = arith.constant 0 : index
      %13 = vector.load %arg6[%c0_11, %c0_12] : memref<8x64xf32, #tpu.memory_space<vmem>>, vector<8x64xf32>
      tpu.vector_store %arg6[%c0_11, %c0_12], %12 {strides = array<i32>} : memref<8x64xf32, #tpu.memory_space<vmem>>, vector<8x64xf32>,
    } else {
    }
    %c0 = arith.constant 0 : index
    %c0_1 = arith.constant 0 : index
    %3 = vector.load %arg6[%c0, %c0_1] : memref<8x64xf32, #tpu.memory_space<vmem>>, vector<8x64xf32>
    %c0_2 = arith.constant 0 : index
    %c0_3 = arith.constant 0 : index
    %4 = vector.load %arg3[%c0_2, %c0_3] : memref<8x64xf32, #tpu.memory_space<vmem>>, vector<8x64xf32>
    %c0_4 = arith.constant 0 : index
    %c0_5 = arith.constant 0 : index
    %5 = vector.load %arg4[%c0_4, %c0_5] : memref<64x64xf32, #tpu.memory_space<vmem>>, vector<64x64xf32>
    %cst = arith.constant dense<0.000000e+00> : vector<8x64xf32>
    %6 = tpu.matmul %4, %5, %cst {dimension_numbers = #tpu.dot_dimension_numbers<[1], [0], [0], [1], [0, 0, 1, 1], [], []>} : vector<8x64xf32>, vector<64x64xf32>, vector<8x64xf32> -> vector<8x64xf32>
    %7 = arith.addf %3, %6 : vector<8x64xf32>
    %c0_6 = arith.constant 0 : index
    %c0_7 = arith.constant 0 : index
    %8 = vector.load %arg6[%c0_6, %c0_7] : memref<8x64xf32, #tpu.memory_space<vmem>>, vector<8x64xf32>
    tpu.vector_store %arg6[%c0_6, %c0_7], %7 {strides = array<i32>} : memref<8x64xf32, #tpu.memory_space<vmem>>, vector<8x64xf32>,
    %c0_i32_8 = arith.constant 0 : i32
    %9 = arith.cmpi eq, %arg2, %c0_i32_8 : i32
    %10 = arith.extui %9 : i1 to i32
    %c0_i32_9 = arith.constant 0 : i32
    %11 = arith.cmpi ne, %10, %c0_i32_9 : i32
    scf.if %11 {
      %c0_10 = arith.constant 0 : index
      %c0_11 = arith.constant 0 : index
      %12 = vector.load %arg6[%c0_10, %c0_11] : memref<8x64xf32, #tpu.memory_space<vmem>>, vector<8x64xf32>
      %c0_12 = arith.constant 0 : index
      %c0_13 = arith.constant 0 : index
      %13 = vector.load %arg5[%c0_12, %c0_13] : memref<8x64xf32, #tpu.memory_space<vmem>>, vector<8x64xf32>
      tpu.vector_store %arg5[%c0_12, %c0_13], %12 {strides = array<i32>} : memref<8x64xf32, #tpu.memory_space<vmem>>, vector<8x64xf32>,
    } else {
    }
    return
  }
  func.func @transform_0(%arg0: i32, %arg1: i32, %arg2: i32) -> (i32, i32) {
    %c0_i32 = arith.constant 0 : i32
    return %arg0, %arg2 : i32, i32
  }
  func.func @transform_1(%arg0: i32, %arg1: i32, %arg2: i32) -> (i32, i32) {
    %c0_i32 = arith.constant 0 : i32
    return %arg2, %arg1 : i32, i32
  }
  func.func @transform_2(%arg0: i32, %arg1: i32, %arg2: i32) -> (i32, i32) {
    %c0_i32 = arith.constant 0 : i32
    return %arg0, %arg1 : i32, i32
  }
}

</mosaic_0001>

<bundles_post_ra>
// kernel: tpu_custom_call.1
= control target key start
LH: loop header
LB: loop body
LE: loop exit
PB: predicated region body
PF: predicated region fallthrough
CT: control target
= control target key end

     0   :  { %7 = vsyncpa [#allocation4], 0  ;;  %s342_s0 = inlined_call_operand.hbm [shape: f32[8,64], index: 0, kind: input, shape index: {}]   ;;  %s343_s1 = inlined_call_operand.hbm [shape: f32[64,64], index: 1, kind: input, shape index: {}]   ;;  %s344_s2 = inlined_call_operand.hbm [shape: f32[8,64], index: 2, kind: output, shape index: {}]  }
   0x1   :  { %8 = vsyncpa [#allocation7], 0 }
   0x2   :  { %9 = vsyncpa [#allocation5], 0  ;;  %s272_s9 = smov [#allocation3]   ;;  %s273_s11 = smov [#allocation6]  }
   0x3   :  { %s16_s10 = sshll.u32 %s272_s9, 4  ;;  %s25_s12 = sshll.u32 %s273_s11, 4  ;;  %s17_s10 = int_to_ptr.vmem [resolvable:$true] %s16_s10  ;;  %s295_s12 = int_to_ptr.vmem [resolvable:$true] %s25_s12 }
   0x4   :  { %s200_s15 = scalar_lea.hbm %s342_s0, 128 }
   0x5   :  { %p201_p0 = scmp.ne.s32.totalorder %s342_s0, %s200_s15  ;;  %p204_p1 = scmp.lt.u32.totalorder %s200_s15, %s342_s0 }
   0x7   :  { %p206_p2 = pnand %p204_p1, %p201_p0 }
   0x9   :  { %209 = shalt.err (!%p206_p2)
}
   0xa   :  { %s210_s20 = scalar_lea.vmem %s17_s10, 128  ;;  %p215_p4 = scmp.lt.s32.totalorder %s17_s10, %s17_s10 }
   0xb   :  { %p211_p3 = scmp.ne.s32.totalorder %s17_s10, %s210_s20  ;;  %p216_p5 = scmp.lt.s32.totalorder %s210_s20, %s210_s20 }
   0xd   :  { %p217_p6 = por %p216_p5, %p215_p4 }
   0xf   :  { %p218_p7 = pnand %p217_p6, %p211_p3 }
  0x11   :  { %221 = shalt.err (!%p218_p7)
}
  0x12   :  { %19 = dma.hbm_to_vmem [thread:$0]  %s342_s0, 128, %s17_s10, [#allocation4]  }
  0x13   :  { %s222_s25 = scalar_lea.hbm %s343_s1, 1024 }
  0x14   :  { %p223_p8 = scmp.ne.s32.totalorder %s343_s1, %s222_s25  ;;  %p226_p9 = scmp.lt.u32.totalorder %s222_s25, %s343_s1 }
  0x16   :  { %p228_p10 = pnand %p226_p9, %p223_p8 }
  0x18   :  { %231 = shalt.err (!%p228_p10)
}
  0x19   :  { %s232_s30 = scalar_lea.vmem %s295_s12, 1024  ;;  %p237_p12 = scmp.lt.s32.totalorder %s295_s12, %s295_s12 }
  0x1a   :  { %p233_p11 = scmp.ne.s32.totalorder %s295_s12, %s232_s30  ;;  %p238_p13 = scmp.lt.s32.totalorder %s232_s30, %s232_s30 }
  0x1c   :  { %p239_p0 = por %p238_p13, %p237_p12 }
  0x1e   :  { %p240_p1 = pnand %p239_p0, %p233_p11 }
  0x20   :  { %243 = shalt.err (!%p240_p1)
}
  0x21   :  { %s274_s0 = smov 128   ;;  %s275_s3 = smov 8  }
  0x22   :  { %31 = dma.hbm_to_vmem [thread:$0]  %s343_s1, 1024, %s295_s12, [#allocation7], %s274_s0, %s274_s0, %s275_s3  }
  0x23   :  { %266 = dma.done.wait [#allocation4], 128  }
  0x24   :  { %267 = vsyncadd [#allocation4], 4294967168 }
  0x25   :  { %268 = dma.done.wait [#allocation7], 1024  }
  0x26   :  { %269 = vsyncadd [#allocation7], 4294966272  ;;  %vm42_vm0 = vcmask 523264   ;;  %v276_v0 = vmov 0.0|0.0   ;;  %v277_v1 = vmov 0.0   ;;  %vm278_vm1 = vmmov 0  }
  0x27   :  { %180 = vmatprep.subr.bf16.mxu0 %v276_v0  ;;  %43 = vst.msk [vmem:[#allocation2] sm:$0xff] %vm42_vm0, %v277_v1  ;;  %177 = vmatprep.mubr.msk.f32.mxu0 %vm278_vm1, %v277_v1  ;;  %v46_v2 = vld [vmem:[#allocation6] sm:$0xff]  ;;  %v47_v3 = vld [vmem:[#allocation6 + $0x8] sm:$0xff]  ;;  %v48_v4 = vld [vmem:[#allocation6 + $0x10] sm:$0xff]  ;;  %s279_s1 = smov [#allocation8]  }
  0x28   :  { %v181_v5 = vpack.c.bf16 %v47_v3, %v46_v2  ;;  %v49_v6 = vld [vmem:[#allocation6 + $0x18] sm:$0xff]  ;;  %v50_v8 = vld [vmem:[#allocation6 + $0x20] sm:$0xff]  ;;  %v51_v9 = vld [vmem:[#allocation6 + $0x28] sm:$0xff]  ;;  %s141_s6 = sshll.u32 %s279_s1, 4  ;;  %s142_s6 = int_to_ptr.vmem [resolvable:$true] %s141_s6 }
  0x29   :  { %v184_v7 = vpack.c.bf16 %v49_v6, %v48_v4  ;;  %v187_v10 = vpack.c.bf16 %v51_v9, %v50_v8  ;;  %v52_v11 = vld [vmem:[#allocation6 + $0x30] sm:$0xff]  ;;  %v53_v12 = vld [vmem:[#allocation6 + $0x38] sm:$0xff]  ;;  %s244_s7 = scalar_lea.vmem %s142_s6, 128  ;;  %p249_p3 = scmp.lt.s32.totalorder %s142_s6, %s142_s6 }
  0x2a   :  { %182 = vmatpush3.bf16.msra.mxu0 %v181_v5  ;;  %v190_v13 = vpack.c.bf16 %v53_v12, %v52_v11  ;;  %v45_v14 = vld [vmem:[#allocation3] sm:$0xff]  ;;  %p245_p2 = scmp.ne.s32.totalorder %s142_s6, %s244_s7  ;;  %p250_p4 = scmp.lt.s32.totalorder %s244_s7, %s244_s7 }
  0x2b   :  { %183 = vmatprep.subr.bf16.mxu0 %v276_v0 }
  0x2c   :  { %p251_p5 = por %p250_p4, %p249_p3 }
  0x2e   :  { %185 = vmatpush3.bf16.msra.mxu0 %v184_v7  ;;  %v44_v15 = vld [vmem:[#allocation2] sm:$0xff]  ;;  %p252_p6 = pnand %p251_p5, %p245_p2 }
  0x2f   :  { %186 = vmatprep.subr.bf16.mxu0 %v276_v0 }
  0x32   :  { %188 = vmatpush3.bf16.msra.mxu0 %v187_v10 }
  0x33   :  { %189 = vmatprep.subr.bf16.mxu0 %v276_v0 }
  0x36   :  { %191 = vmatpush3.bf16.msra.mxu0 %v190_v13 }
  0x39   :  { %178 = vmatmul.mubr.msk.f32.vlgmr.msra.gmra.mrb[0].mxu0 %vm42_vm0, %v45_v14 }
 0x10c   :  { %v124_v16 = vpop.f32.mrb[0].mxu0 }
 0x10d   :  { %v128_v17 = vadd.f32 %v124_v16, %v44_v15  ;;  %v179_v18 = vpop.f32.mrb[1].mxu0 }
 0x10f   :  { %129 = vst.msk [vmem:[#allocation2] sm:$0xff] %vm42_vm0, %v128_v17 }
 0x116   :  { %v133_v19 = vld [vmem:[#allocation2] sm:$0xff] }
 0x117   :  { %134 = vst.msk [vmem:[#allocation8] sm:$0xff] %vm42_vm0, %v133_v19 }
 0x118   :  { %255 = shalt.err (!%p252_p6)
}
 0x119   :  { %s256_s10 = scalar_lea.hbm %s344_s2, 128 }
 0x11a   :  { %p257_p7 = scmp.ne.s32.totalorder %s344_s2, %s256_s10  ;;  %p260_p8 = scmp.lt.u32.totalorder %s256_s10, %s344_s2 }
 0x11c   :  { %p262_p9 = pnand %p260_p8, %p257_p7 }
 0x11e   :  { %265 = shalt.err (!%p262_p9)
}
 0x11f   :  { %144 = dma.vmem_to_hbm [thread:$0]  %s142_s6, 128, %s344_s2, [#allocation5]  }
 0x120   :  { %270 = dma.done.wait [#allocation5], 128  }
 0x121   :  { %271 = vsyncadd [#allocation5], 4294967168 }
 0x122   :  { %148 = vsyncpa [#allocation4], 1 }
 0x123   :  { %149 = vsyncpa [#allocation7], 1 }
 0x124   :  { %150 = vsyncpa [#allocation5], 1 }

</bundles_post_ra>
